<compile_context>
chip_gen: v7x
topology: tpu7x:2x2x1
jax: 0.10.0
libtpu: 0.0.40
codegen_flags: <defaults>
</compile_context>

<pallas_src>
import jax
import jax.numpy as jnp
from jax.experimental import pallas as pl
from jax.experimental.pallas import tpu as pltpu

BN_EPS = 1e-5


def _round_up(x, m):
    return ((x + m - 1) // m) * m


def _l2_normalize(v, eps=1e-12):
    return v / (jnp.linalg.norm(v) + eps)


def spectral_normalize_convT(weight, u, n_iter=1, eps=1e-12):
    """torch.nn.utils.spectral_norm for ConvTranspose2d (uses dim=1).

    weight: (nz, channel, kh, kw), u: (channel,).  One power iteration, then
    sigma = u^T W_mat v with W_mat = weight.permute(1,0,2,3).reshape(channel,-1).
    """
    nz, ch, kh, kw = weight.shape
    w_mat = jnp.transpose(weight, (1, 0, 2, 3)).reshape(ch, -1)
    v = None
    for _ in range(n_iter):
        v = _l2_normalize(w_mat.T @ u, eps)
        u = _l2_normalize(w_mat @ v, eps)
    sigma = jnp.dot(u, w_mat @ v)
    # TODO(synk): PyTorch updates the power-iteration vector `u` in place during
    # training-mode forwards; that training-loop state update is not returned here.
    return weight / sigma


def init_mm_kernel(z_ref, w_ref, shift_ref, o_ref):
    # z_ref: (TM, K) bf16, w_ref: (K, TN) bf16 (BN scale pre-folded),
    # shift_ref: (8, TN) f32 (identical rows), o_ref: (TM, TN) out_dtype.
    acc = jnp.dot(z_ref[...], w_ref[...], preferred_element_type=jnp.float32)
    y = acc + shift_ref[...][:1, :]                      # folded ConvT-bias + BN shift
    o_ref[...] = jnp.maximum(y, 0.0).astype(o_ref.dtype)  # ReLU


def _vmem_caps():
    """Generation-aware VMEM sizing: (tile budget bytes, scoped vmem limit bytes)."""
    try:
        phys = int(pltpu.get_tpu_info().vmem_capacity_bytes)
    except Exception:
        phys = 64 * 1024 * 1024        # conservative fallback (v7x per-TC VMEM)
    tile_budget = phys // 2            # bytes usable by pipeline buffers
    vmem_limit = (phys * 5) // 8       # leaves headroom for compiler scratch/spills
    return tile_budget, vmem_limit


def _choose_tm(m, k, n_pad, out_bytes, budget_bytes):
    """Largest M-tile (multiple of 16, <=2048) whose pipeline buffers fit the budget.
    The constant-index weight/shift specs still get 2 pipeline buffers by default,
    so they are counted twice here."""
    cap = _round_up(max(m, 16), 16)
    for tm in (2048, 1024, 512, 256, 128, 64, 32, 16):
        if tm > cap:
            continue
        need = (2 * tm * k * 2                # double-buffered bf16 noise tiles
                + 2 * k * n_pad * 2           # bf16 weight (2 pipeline buffers)
                + 2 * tm * n_pad * out_bytes  # double-buffered output tiles
                + 2 * 8 * n_pad * 4)          # shift rows (2 pipeline buffers)
        if need <= budget_bytes:
            return tm
    return 16


def init_layer(noise, weight, bias, u, gamma, beta, running_mean, running_var,
               *, bn_eps=BN_EPS, compute_dtype=jnp.bfloat16, out_dtype=jnp.bfloat16):
    """InitLayer forward. noise: (N, nz) or (N, nz, 1, 1). Returns (N, channel, 4, 4)."""
    n = noise.shape[0]
    z = noise.reshape(n, -1).astype(jnp.float32)     # == noise.view(N, -1, 1, 1)
    nz, ch, kh, kw = weight.shape
    assert z.shape[1] == nz, (z.shape, weight.shape)

    # ---- parameter glue (tiny, plain JAX) ----
    w_sn = spectral_normalize_convT(weight, u)
    # GEMM column ordering is (co, ky, kx) -> output reshapes straight to NCHW.
    w_mat = w_sn.reshape(nz, ch * kh * kw)
    inv_std = gamma / jnp.sqrt(running_var + bn_eps)                 # per-channel BN scale
    scale_col = jnp.repeat(inv_std, kh * kw)
    shift_col = jnp.repeat((bias - running_mean) * inv_std + beta, kh * kw)
    w_fold = w_mat * scale_col[None, :]         # fold BN scale into the GEMM weight
    c_total = ch * kh * kw
    # TODO(synk): training-mode BatchNorm (batch statistics + running-stat update)
    # is not implemented; this is eval-mode BN folded into the GEMM/epilogue.

    # ---- lane-dense / tile-aligned padding & tiling ----
    n_pad = _round_up(c_total, 128)             # lane-dense MXU result + unmasked stores
    out_bytes = jnp.dtype(out_dtype).itemsize
    tile_budget, vmem_limit = _vmem_caps()
    tm = _choose_tm(n, nz, n_pad, out_bytes, tile_budget)
    m_pad = _round_up(max(n, 16), tm)           # >=16 rows: full bf16 (16,128) tiles
    m_tiles = m_pad // tm
    # Small batch -> single M tile: split columns into a second parallel axis so
    # both v7x TensorCores get work (harmless extra grid dim on v5e/v6e).
    n_tiles = 2 if (m_tiles < 2 and n_pad % 256 == 0) else 1
    tn = n_pad // n_tiles

    z_p = jnp.zeros((m_pad, nz), compute_dtype).at[:n].set(z.astype(compute_dtype))
    w_p = jnp.zeros((nz, n_pad), compute_dtype).at[:, :c_total].set(
        w_fold.astype(compute_dtype))
    shift_p = jnp.zeros((8, n_pad), jnp.float32).at[:, :c_total].set(
        jnp.broadcast_to(shift_col, (8, c_total)))

    cost = pl.CostEstimate(
        flops=2 * m_pad * nz * n_pad,
        transcendentals=0,
        bytes_accessed=(m_pad * nz * 2 + nz * n_pad * 2 + 8 * n_pad * 4
                        + m_pad * n_pad * out_bytes))

    out = pl.pallas_call(
        init_mm_kernel,
        out_shape=jax.ShapeDtypeStruct((m_pad, n_pad), out_dtype),
        grid_spec=pltpu.PrefetchScalarGridSpec(
            num_scalar_prefetch=0,
            grid=(m_tiles, n_tiles),
            in_specs=[
                pl.BlockSpec((tm, nz), lambda i, j: (i, 0)),   # noise tile (pipelined)
                pl.BlockSpec((nz, tn), lambda i, j: (0, j)),   # folded weight strip
                pl.BlockSpec((8, tn), lambda i, j: (0, j)),    # folded bias/BN shift
            ],
            out_specs=pl.BlockSpec((tm, tn), lambda i, j: (i, j)),
        ),
        compiler_params=pltpu.CompilerParams(
            dimension_semantics=("parallel", "parallel"),      # shard across v7x's 2 TCs
            vmem_limit_bytes=int(vmem_limit),
        ),
        cost_estimate=cost,
    )(z_p, w_p, shift_p)

    return out[:n, :c_total].reshape(n, ch, kh, kw)    # already NCHW, no transpose


def reference(noise, weight, bias, u, gamma, beta, running_mean, running_var,
              bn_eps=BN_EPS, cast_dtype=None):
    """Pure-JAX reference of the same forward pass."""
    n = noise.shape[0]
    z = noise.reshape(n, -1).astype(jnp.float32)
    w_sn = spectral_normalize_convT(weight, u)
    if cast_dtype is not None:                  # roughly match the kernel's operand rounding
        z = z.astype(cast_dtype).astype(jnp.float32)
        w_sn = w_sn.astype(cast_dtype).astype(jnp.float32)
    y = jnp.einsum('ni,icyx->ncyx', z, w_sn) + bias.reshape(1, -1, 1, 1)
    inv_std = (gamma / jnp.sqrt(running_var + bn_eps)).reshape(1, -1, 1, 1)
    y = (y - running_mean.reshape(1, -1, 1, 1)) * inv_std + beta.reshape(1, -1, 1, 1)
    return jnp.maximum(y, 0.0)


if __name__ == "__main__":
    key = jax.random.PRNGKey(0)
    ks = jax.random.split(key, 8)

    N, NZ, CH = 2, 256, 32                       # InitLayer(nz=256, channel=32)
    noise = jax.random.normal(ks[0], (N, NZ), jnp.float32)
    # ConvTranspose2d weight layout is (in_channels, out_channels, kh, kw)
    weight = jax.random.normal(ks[1], (NZ, CH, 4, 4), jnp.float32) * 0.1
    bias = jax.random.normal(ks[2], (CH,), jnp.float32) * 0.1
    u = _l2_normalize(jax.random.normal(ks[3], (CH,), jnp.float32))   # SN power-iter vec
    gamma = 1.0 + 0.1 * jax.random.normal(ks[4], (CH,), jnp.float32)
    beta = 0.1 * jax.random.normal(ks[5], (CH,), jnp.float32)
    running_mean = 0.1 * jax.random.normal(ks[6], (CH,), jnp.float32)
    running_var = jax.random.uniform(ks[7], (CH,), jnp.float32, minval=0.5, maxval=1.5)

    y = init_layer(noise, weight, bias, u, gamma, beta, running_mean, running_var)
    y = jax.block_until_ready(y)
    assert y.shape == (N, CH, 4, 4), y.shape
    y_f = y.astype(jnp.float32)

    # Check vs a reference using bf16-rounded operands (kernel also rounds its
    # bf16 output, so tolerances are bf16-level).
    y_bf = reference(noise, weight, bias, u, gamma, beta, running_mean, running_var,
                     cast_dtype=jnp.bfloat16)
    assert jnp.allclose(y_f, y_bf, atol=2e-2, rtol=2e-2), \
        float(jnp.max(jnp.abs(y_f - y_bf)))

    # Looser check vs the exact f32 reference (difference is bf16 rounding only).
    y_f32 = reference(noise, weight, bias, u, gamma, beta, running_mean, running_var)
    assert jnp.allclose(y_f, y_f32, atol=4e-2, rtol=4e-2), \
        float(jnp.max(jnp.abs(y_f - y_f32)))

    print("KERNEL_OK")
</pallas_src>

<mosaic_0001>
module attributes {stable_mosaic.version = 11 : i64} {
  func.func @init_mm_kernel(%arg0: i32, %arg1: i32, %arg2: memref<16x256xbf16, #tpu.memory_space<vmem>>, %arg3: memref<256x256xbf16, #tpu.memory_space<vmem>>, %arg4: memref<8x256xf32, #tpu.memory_space<vmem>>, %arg5: memref<16x256xbf16, #tpu.memory_space<vmem>>) attributes {dimension_semantics = [#tpu.dimension_semantics<parallel>, #tpu.dimension_semantics<parallel>], iteration_bounds = array<i64: 1, 2>, scalar_prefetch = 0 : i64, scratch_operands = 0 : i64, tpu.core_type = #tpu.core_type<tc>, window_params = [{transform_indices = @transform_0, window_bounds = array<i64: 16, 256>}, {transform_indices = @transform_1, window_bounds = array<i64: 256, 256>}, {transform_indices = @transform_2, window_bounds = array<i64: 8, 256>}, {transform_indices = @transform_3, window_bounds = array<i64: 16, 256>}]} {
    %c0 = arith.constant 0 : index
    %c0_0 = arith.constant 0 : index
    %0 = vector.load %arg2[%c0, %c0_0] : memref<16x256xbf16, #tpu.memory_space<vmem>>, vector<16x256xbf16>
    %c0_1 = arith.constant 0 : index
    %c0_2 = arith.constant 0 : index
    %1 = vector.load %arg3[%c0_1, %c0_2] : memref<256x256xbf16, #tpu.memory_space<vmem>>, vector<256x256xbf16>
    %cst = arith.constant dense<0.000000e+00> : vector<16x256xf32>
    %2 = tpu.matmul %0, %1, %cst {dimension_numbers = #tpu.dot_dimension_numbers<[1], [0], [0], [1], [0, 0, 1, 1], [], []>} : vector<16x256xbf16>, vector<256x256xbf16>, vector<16x256xf32> -> vector<16x256xf32>
    %c0_3 = arith.constant 0 : index
    %c0_4 = arith.constant 0 : index
    %3 = vector.load %arg4[%c0_3, %c0_4] : memref<8x256xf32, #tpu.memory_space<vmem>>, vector<8x256xf32>
    %4 = vector.extract_strided_slice %3 {offsets = [0, 0], sizes = [1, 256], strides = [1, 1]} : vector<8x256xf32> to vector<1x256xf32>
    %5 = vector.broadcast %4 : vector<1x256xf32> to vector<16x256xf32>
    %6 = arith.addf %2, %5 : vector<16x256xf32>
    %cst_5 = arith.constant 0.000000e+00 : f32
    %7 = vector.broadcast %cst_5 : f32 to vector<16x256xf32>
    %8 = arith.maximumf %6, %7 : vector<16x256xf32>
    %9 = arith.truncf %8 : vector<16x256xf32> to vector<16x256xbf16>
    %c0_6 = arith.constant 0 : index
    %c0_7 = arith.constant 0 : index
    %10 = vector.load %arg5[%c0_6, %c0_7] : memref<16x256xbf16, #tpu.memory_space<vmem>>, vector<16x256xbf16>
    tpu.vector_store %arg5[%c0_6, %c0_7], %9 {strides = array<i32>} : memref<16x256xbf16, #tpu.memory_space<vmem>>, vector<16x256xbf16>,
    return
  }
  func.func @transform_0(%arg0: i32, %arg1: i32) -> (i32, i32) {
    %c0_i32 = arith.constant 0 : i32
    %c0_i32_0 = arith.constant 0 : i32
    return %arg0, %c0_i32 : i32, i32
  }
  func.func @transform_1(%arg0: i32, %arg1: i32) -> (i32, i32) {
    %c0_i32 = arith.constant 0 : i32
    %c0_i32_0 = arith.constant 0 : i32
    return %c0_i32, %arg1 : i32, i32
  }
  func.func @transform_2(%arg0: i32, %arg1: i32) -> (i32, i32) {
    %c0_i32 = arith.constant 0 : i32
    %c0_i32_0 = arith.constant 0 : i32
    return %c0_i32, %arg1 : i32, i32
  }
  func.func @transform_3(%arg0: i32, %arg1: i32) -> (i32, i32) {
    %c0_i32 = arith.constant 0 : i32
    return %arg0, %arg1 : i32, i32
  }
}

</mosaic_0001>

<bundles_post_ra>
// kernel: tpu_custom_call.1
= control target key start
LH: loop header
LB: loop body
LE: loop exit
PB: predicated region body
PF: predicated region fallthrough
CT: control target
= control target key end

     0   :  { %s1377_s0 = inlined_call_operand.hbm [shape: bf16[16,256], index: 0, kind: input, shape index: {}]   ;;  %s1378_s1 = inlined_call_operand.hbm [shape: bf16[256,512], index: 1, kind: input, shape index: {}]   ;;  %s1379_s2 = inlined_call_operand.hbm [shape: f32[8,512], index: 2, kind: input, shape index: {}]   ;;  %s1380_s3 = inlined_call_operand.hbm [shape: bf16[16,512], index: 3, kind: output, shape index: {}]  }
   0x1   :  { %1388 = sst [smem:[#allocation12_spill]] %s1378_s1 }
   0x2   :  { %8 = vsyncpa [#allocation3], 0 }
   0x3   :  { %9 = vsyncpa [#allocation6], 0 }
   0x4   :  { %11 = vsyncpa [#allocation6 + $0x1], 0 }
   0x5   :  { %12 = vsyncpa [#allocation4], 0 }
   0x6   :  { %14 = vsyncpa [#allocation4 + $0x1], 0  ;;  %s1080_s12 = smov 0   ;;  %s1082_s13 = smov 0  }
   0x7   :  { %s1084_s14 = smov 0   ;;  %s1086_s15 = smov 0  }
   0x8   :  { %s1088_s16 = smov 0   ;;  %s1090_s17 = smov 0  }
   0x9 LB: > { %s29_s18 = sadd.s32 1, %s1044_s16  ;;  %s65_s19 = sadd.s32 1, %s1036_s14  ;;  %s1048_s17 = sphi %s1090_s17, %s20_s17   ;;  %s1044_s16 = sphi %s1088_s16, %s1411_s16   ;;  %s1040_s15 = sphi %s1086_s15, %s1410_s15   ;;  %s1036_s14 = sphi %s1084_s14, %s1409_s14   ;;  %s1032_s13 = sphi %s1082_s13, %s1408_s13   ;;  %s1028_s12 = sphi %s1080_s12, %s1407_s12  }
   0xa   : > { %p30_p0 = scmp.ge.s32.totalorder %s29_s18, 2  ;;  %p72_p1 = scmp.ne.s32.totalorder %s1036_s14, %s1032_s13 }
   0xb   : > { %p73_p2 = scmp.eq.s32.totalorder %s1048_s17, 0  ;;  %p765_p6 = scmp.lt.s32.totalorder %s1048_s17, 2 }
   0xc   : > { %s1413_s18 = smov (%p30_p0, %s29_s18), 0  ;;  %s173_s22 = sand.u32 1, %s1048_s17  }
   0xd   : > { %p1120_p3 = por %p73_p2, %p72_p1  ;;  %s62_s21 = ssub.s32 %s1044_s16, %s1413_s18 }
   0xe   : > { %p63_p5 = scmp.eq.s32.totalorder %s62_s21, 0  ;;  %s175_s23 = sand.u32 1, %s1036_s14  }
   0xf   : > { %s682_s25 = sshll.u32 %s175_s23, 8  ;;  %s734_s26 = sshll.u32 %s1044_s16, 7 }
  0x10   : > { %s1131_s24 = scalar_select %p63_p5, %s1036_s14, %s65_s19  }
  0x11   : > { %s1390_s1 = sld [smem:[#allocation12_spill]]  ;;  %s177_s30 = scalar_lea.vmem [#allocation5], %s682_s25 }
  0x12   : > { %s184_s4 = sshll.u32 %s177_s30, 4  ;;  %p1145_p7 = pnand %p765_p6, %p1120_p3  ;;  %s1141_s4 = int_to_ptr.vmem [resolvable:$true] %s184_s4 }
  0x13   : > { %s1149_s6 = scalar_lea.sflag [#allocation6], %s173_s22 }
  0x14   : > { %p876_p9 = pneg %p1145_p7 }
  0x17   : > { %s1139_s29 = scalar_lea.hbm %s1390_s1, %s734_s26  ;;  %s879_s10 = scalar_lea.hbm %s1390_s1, 8192 }
  0x18   : > { %s874_s7 = scalar_lea.hbm %s1139_s29, 4096  ;;  %p880_p12 = scmp.lt.u32.totalorder %s1139_s29, %s1390_s1 }
  0x19   : > { %p875_p8 = scmp.ne.s32.totalorder %s1139_s29, %s874_s7  ;;  %p881_p13 = scmp.lt.u32.totalorder %s879_s10, %s874_s7 }
  0x1a   : > { %p883_p2 = scmp.lt.u32.totalorder %s874_s7, %s1139_s29 }
  0x1b   : > { %p877_p10 = pnand %p876_p9, %p875_p8  ;;  %p882_p0 = por %p881_p13, %p880_p12 }
  0x1d   : > { %p878_p11 = pneg %p877_p10  ;;  %p884_p3 = por %p883_p2, %p882_p0 }
  0x1f   : > { %p885_p5 = pnand %p884_p3, %p878_p11 }
  0x21   : > { %888 = shalt.err (!%p885_p5)
}
  0x22   : > { %s889_s20 = scalar_lea.vmem %s1141_s4, 4096  ;;  %s1050_s21 = smov [#allocation5]  }
  0x23   : > { %p890_p6 = scmp.ne.s32.totalorder %s1141_s4, %s889_s20  ;;  %s894_s22 = sshll.u32 %s1050_s21, 4  ;;  %s895_s22 = int_to_ptr.vmem [resolvable:$false] %s894_s22 }
  0x24   : > { %s896_s25 = scalar_lea.vmem %s895_s22, 8192  ;;  %p897_p4 = scmp.lt.s32.totalorder %s1141_s4, %s895_s22 }
  0x25   : > { %p892_p8 = pnand %p890_p6, %p876_p9  ;;  %p898_p12 = scmp.lt.s32.totalorder %s896_s25, %s889_s20 }
  0x27   : > { %p893_p10 = pneg %p892_p8  ;;  %p899_p13 = por %p898_p12, %p897_p4 }
  0x29   : > { %p900_p0 = pnand %p899_p13, %p893_p10 }
  0x2b   : > { %903 = shalt.err (!%p900_p0)
}
  0x2c   : > { %s1051_s26 = smov 256   ;;  %s1381_s27 = smov 128  }
  0x2d   : > { %s1382_s28 = smov 8   ;;  %s1180_s30 = sadd.s32 4294967295, %s1048_s17  }
  0x2e   : > { %756 = dma.hbm_to_vmem [thread:$0]  (!%p1145_p7), %s1139_s29, 4096, %s1141_s4, %s1149_s6, %s1051_s26, %s1381_s27, %s1382_s28  }
  0x2f   : > { %s678_s7 = sadd.s32 4294967294, %s1048_s17   ;;  %p78_p4 = scmp.ne.s32.totalorder %s1032_s13, %s1028_s12 }
  0x30   : > { %p1383_p11 = scmp.eq.s32.totalorder %s1180_s30, 0  ;;  %p130_p2 = scmp.eq.s32.totalorder %s1180_s30, 1 }
  0x31   : > { %p136_p3 = scmp.eq.s32.totalorder %s678_s7, 1  ;;  %p679_p6 = scmp.ge.s32.totalorder %s1048_s17, 1 }
  0x32   : > { %p1189_p5 = por %p1383_p11, %p78_p4  ;;  %p1197_p8 = por %p130_p2, %p72_p1 }
  0x33   : > { %p1201_p10 = por %p136_p3, %p78_p4  ;;  %p143_p12 = scmp.lt.s32.totalorder %s1048_s17, 3 }
  0x34   : > { %s1392_s8 = scalar_select %p1189_p5, 1, 0 }
  0x35   : > { %s1393_s29 = scalar_select %p1197_p8, 1, 0 }
  0x36   : > { %s1394_s4 = scalar_select %p1201_p10, 1, 0 }
  0x37   : > { %s685_s9 = sshll.u32 %s175_s23, 4  ;;  %p1208_p13 = pnand %p679_p6, %p143_p12 }
  0x38   : > { %s1054_s11 = smov [#allocation2]   ;;  %s735_s20 = sshll.u32 %s1044_s16, 8 }
  0x39   : > { %s1395_s10 = scalar_select %p1208_p13, 1, 0 }
  0x3a   : > { %s159_s19 = sshll.u32 %s1054_s11, 4  ;;  %p749_p1 = pneg %p1208_p13  ;;  %s1212_s19 = int_to_ptr.vmem [resolvable:$true] %s159_s19 }
  0x3b   : > { %s1220_s25 = scalar_lea.hbm %s1379_s2, %s735_s20  ;;  %s198_s23 = scalar_lea.vmem [#allocation7], %s685_s9 }
  0x3c   : > { %s206_s26 = sshll.u32 %s198_s23, 4  ;;  %p1224_p0 = pnand %p749_p1, %p1383_p11  ;;  %s207_s26 = int_to_ptr.vmem [resolvable:$true] %s206_s26 }
  0x3d   : > { %s904_s11 = scalar_lea.hbm %s1220_s25, 256  ;;  %s909_s22 = scalar_lea.hbm %s1379_s2, 512 }
  0x3e   : > { %s1396_s7 = scalar_select %p1224_p0, 1, 0 }
  0x3f   : > { %p905_p4 = scmp.ne.s32.totalorder %s1220_s25, %s904_s11  ;;  %p910_p6 = scmp.lt.u32.totalorder %s1220_s25, %s1379_s2 }
  0x40   : > { %p911_p12 = scmp.lt.u32.totalorder %s909_s22, %s904_s11  ;;  %p913_p11 = scmp.lt.u32.totalorder %s904_s11, %s1220_s25 }
  0x41   : > { %p907_p2 = pnand %p905_p4, %p876_p9 }
  0x42   : > { %p912_p1 = por %p911_p12, %p910_p6 }
  0x43   : > { %p908_p3 = pneg %p907_p2 }
  0x44   : > { %p914_p10 = por %p913_p11, %p912_p1 }
  0x46   : > { %p915_p8 = pnand %p914_p10, %p908_p3 }
  0x48   : > { %918 = shalt.err (!%p915_p8)
}
  0x49   : > { %s919_s9 = scalar_lea.vmem %s207_s26, 256  ;;  %s1055_s23 = smov [#allocation7]  }
  0x4a   : > { %p920_p5 = scmp.ne.s32.totalorder %s207_s26, %s919_s9  ;;  %s924_s20 = sshll.u32 %s1055_s23, 4  ;;  %s925_s20 = int_to_ptr.vmem [resolvable:$false] %s924_s20 }
  0x4b   : > { %s926_s21 = scalar_lea.vmem %s925_s20, 512  ;;  %p927_p13 = scmp.lt.s32.totalorder %s207_s26, %s925_s20 }
  0x4c   : > { %p922_p4 = pnand %p920_p5, %p876_p9  ;;  %p928_p0 = scmp.lt.s32.totalorder %s926_s21, %s919_s9 }
  0x4e   : > { %p923_p2 = pneg %p922_p4  ;;  %p929_p6 = por %p928_p0, %p927_p13 }
  0x50   : > { %p930_p12 = pnand %p929_p6, %p923_p2 }
  0x52   : > { %933 = shalt.err (!%p930_p12)
}
  0x53   : > { %759 = dma.hbm_to_vmem [thread:$0]  (!%p1145_p7), %s1220_s25, 256, %s207_s26, %s1149_s6  }
  0x54   : > { %s934_s11 = scalar_lea.hbm %s1377_s0, 256  ;;  %p1397_p11 = scmp.ne.s32.totalorder %s1396_s7, 0 }
  0x55   : > { %p935_p9 = scmp.ne.s32.totalorder %s1377_s0, %s934_s11  ;;  %p941_p13 = scmp.lt.u32.totalorder %s934_s11, %s1377_s0 }
  0x56   : > { %p936_p5 = pneg %p1397_p11 }
  0x58   : > { %p937_p8 = pnand %p936_p5, %p935_p9 }
  0x5a   : > { %p938_p10 = pneg %p937_p8 }
  0x5c   : > { %p943_p0 = pnand %p941_p13, %p938_p10 }
  0x5e   : > { %946 = shalt.err (!%p943_p0)
}
  0x5f   : > { %s947_s5 = scalar_lea.vmem %s1212_s19, 256  ;;  %p955_p4 = scmp.lt.s32.totalorder %s1212_s19, %s1212_s19 }
  0x60   : > { %p948_p7 = scmp.ne.s32.totalorder %s1212_s19, %s947_s5  ;;  %p956_p2 = scmp.lt.s32.totalorder %s947_s5, %s947_s5 }
  0x62   : > { %p950_p3 = pnand %p948_p7, %p936_p5  ;;  %p957_p6 = por %p956_p2, %p955_p4 }
  0x64   : > { %p951_p1 = pneg %p950_p3 }
  0x66   : > { %p958_p12 = pnand %p957_p6, %p951_p1 }
  0x68   : > { %961 = shalt.err (!%p958_p12)
}
  0x69   : > { %s1398_s1 = smov 8   ;;  %s1399_s6 = smov 128  }
  0x6a   : > { %752 = dma.hbm_to_vmem [thread:$0]  (!%p1397_p11), %s1377_s0, 256, %s1212_s19, [#allocation3], %s1399_s6, %s1399_s6, %s1398_s1  }
  0x6b   : > { %p1400_p9 = scmp.ne.s32.totalorder %s1395_s10, 0 }
  0x6c   : > { %p1401_p5 = scmp.eq.s32.totalorder (!%p1400_p9), %s1180_s30, 0 }
  0x6d   : > { %215 = sbr.rel (%p1400_p9) target bundleno = 424 (0x1a8), region = 32 }
  0x74   : > { %1015 = dma.done.wait (%p1401_p5), [#allocation3], 256   ;;  %p1402_p8 = pmov %p1401_p5 }
  0x75   : > { %s221_s7 = sand.u32 1, %s1180_s30   ;;  %s1280_s20 = sand.u32 1, %s1032_s13  }
  0x76   : > { %1017 = vsyncadd (%p1402_p8), [#allocation3], 4294967040  ;;  %s690_s21 = sshll.u32 %s1280_s20, 8  ;;  %s222_s27 = scalar_lea.sflag [#allocation6], %s221_s7 }
  0x77   : > { %s1283_s28 = scalar_lea.vmem [#allocation5], %s690_s21  ;;  %p1403_p11 = scmp.ne.s32.totalorder %s1392_s8, 0 }
  0x79   : > { %1019 = dma.done.wait (%p1403_p11), %s222_s27, 4352  }
  0x7a   : > { %1021 = vsyncadd (%p1403_p11), %s222_s27, 4294962944  ;;  %v823_v0 = vld [vmem:[%s1283_s28 + $0x4] ss:$8 sps:$4 sm:$0xff]   ;;  %v825_v1 = vld [vmem:[%s1283_s28] ss:$8 sps:$4 sm:$0xff]   ;;  %v303_v34 = vlaneseq  ;;  %s691_s30 = sshll.u32 %s1280_s20, 4 }
  0x7b   : > { %481 = vmatprep.subr.bf16.mxu0 %v823_v0  ;;  %v826_v2 = vld [vmem:[%s1283_s28 + $0x14] ss:$8 sps:$4 sm:$0xff]   ;;  %v828_v3 = vld [vmem:[%s1283_s28 + $0x10] ss:$8 sps:$4 sm:$0xff]   ;;  %v829_v4 = vld [vmem:[%s1283_s28 + $0x24] ss:$8 sps:$4 sm:$0xff]  }
  0x7c   : > { %482 = vmatpush1.bf16.msra.mxu0 %v825_v1  ;;  %v831_v5 = vld [vmem:[%s1283_s28 + $0x20] ss:$8 sps:$4 sm:$0xff]   ;;  %v832_v6 = vld [vmem:[%s1283_s28 + $0x34] ss:$8 sps:$4 sm:$0xff]   ;;  %v834_v7 = vld [vmem:[%s1283_s28 + $0x30] ss:$8 sps:$4 sm:$0xff]  }
  0x7d   : > { %483 = vmatprep.subr.bf16.mxu0 %v826_v2  ;;  %v835_v8 = vld [vmem:[%s1283_s28 + $0x44] ss:$8 sps:$4 sm:$0xff]   ;;  %v837_v9 = vld [vmem:[%s1283_s28 + $0x40] ss:$8 sps:$4 sm:$0xff]   ;;  %v838_v10 = vld [vmem:[%s1283_s28 + $0x54] ss:$8 sps:$4 sm:$0xff]  }
  0x7e   : > { %v840_v11 = vld [vmem:[%s1283_s28 + $0x50] ss:$8 sps:$4 sm:$0xff]   ;;  %v841_v12 = vld [vmem:[%s1283_s28 + $0x64] ss:$8 sps:$4 sm:$0xff]   ;;  %v873_v13 = vld [vmem:[#allocation2 + $0x4] ss:$8 sps:$4 sm:$0xff]  }
  0x7f   : > { %v843_v14 = vld [vmem:[%s1283_s28 + $0x60] ss:$8 sps:$4 sm:$0xff]   ;;  %v844_v15 = vld [vmem:[%s1283_s28 + $0x74] ss:$8 sps:$4 sm:$0xff]   ;;  %513 = vmatprep.mubr.bf16.mxu0 %v873_v13  ;;  %v846_v16 = vld [vmem:[%s1283_s28 + $0x70] ss:$8 sps:$4 sm:$0xff]  }
  0x80   : > { %484 = vmatpush1.bf16.msra.mxu0 %v828_v3  ;;  %v847_v17 = vld [vmem:[%s1283_s28 + $0x84] ss:$8 sps:$4 sm:$0xff]   ;;  %v849_v18 = vld [vmem:[%s1283_s28 + $0x80] ss:$8 sps:$4 sm:$0xff]   ;;  %v850_v19 = vld [vmem:[%s1283_s28 + $0x94] ss:$8 sps:$4 sm:$0xff]  }
  0x81   : > { %485 = vmatprep.subr.bf16.mxu0 %v829_v4  ;;  %v852_v20 = vld [vmem:[%s1283_s28 + $0x90] ss:$8 sps:$4 sm:$0xff]   ;;  %v853_v21 = vld [vmem:[%s1283_s28 + $0xa4] ss:$8 sps:$4 sm:$0xff]   ;;  %v855_v22 = vld [vmem:[%s1283_s28 + $0xa0] ss:$8 sps:$4 sm:$0xff]  }
  0x82   : > { %v856_v23 = vld [vmem:[%s1283_s28 + $0xb4] ss:$8 sps:$4 sm:$0xff]   ;;  %v858_v24 = vld [vmem:[%s1283_s28 + $0xb0] ss:$8 sps:$4 sm:$0xff]   ;;  %v859_v25 = vld [vmem:[%s1283_s28 + $0xc4] ss:$8 sps:$4 sm:$0xff]  }
  0x83   : > { %v861_v26 = vld [vmem:[%s1283_s28 + $0xc0] ss:$8 sps:$4 sm:$0xff]   ;;  %v862_v27 = vld [vmem:[%s1283_s28 + $0xd4] ss:$8 sps:$4 sm:$0xff]   ;;  %v864_v28 = vld [vmem:[%s1283_s28 + $0xd0] ss:$8 sps:$4 sm:$0xff]  }
  0x84   : > { %486 = vmatpush1.bf16.msra.mxu0 %v831_v5  ;;  %v865_v29 = vld [vmem:[%s1283_s28 + $0xe4] ss:$8 sps:$4 sm:$0xff]   ;;  %v867_v30 = vld [vmem:[%s1283_s28 + $0xe0] ss:$8 sps:$4 sm:$0xff]   ;;  %v868_v31 = vld [vmem:[%s1283_s28 + $0xf4] ss:$8 sps:$4 sm:$0xff]  }
  0x85   : > { %487 = vmatprep.subr.bf16.mxu0 %v832_v6  ;;  %v870_v32 = vld [vmem:[%s1283_s28 + $0xf0] ss:$8 sps:$4 sm:$0xff]   ;;  %v304_v35 = vshrl.u32 %v303_v34, 7  ;;  %s234_s8 = scalar_lea.vmem [#allocation7], %s691_s30  ;;  %s261_s10 = scalar_lea.vmem [#allocation8], %s691_s30 }
  0x86   : > { %v871_v33 = vld [vmem:[#allocation2] ss:$8 sps:$4 sm:$0xff]   ;;  %s559_s19 = sshll.u32 %s261_s10, 4  ;;  %s738_s11 = sshll.u32 %s1040_s15, 7  ;;  %s1323_s19 = int_to_ptr.vmem [resolvable:$true] %s559_s19 }
  0x87   : > { %v305_v36 = vsub.s32 0, %v304_v35  ;;  %v301_v37 = vld [vmem:[%s234_s8] sm:$0xff]  ;;  %v302_v38 = vld [vmem:[%s234_s8 + $0x8] sm:$0xff]  ;;  %s1328_s23 = scalar_lea.hbm %s1380_s3, %s738_s11  ;;  %s543_s5 = scalar_lea.sflag [#allocation4], %s1280_s20 }
  0x88   : > { %488 = vmatpush1.bf16.msra.mxu0 %v834_v7  ;;  %s962_s1 = scalar_lea.vmem %s1323_s19, 256  ;;  %p1404_p13 = scmp.ne.s32.totalorder %s1393_s29, 0 }
  0x89   : > { %489 = vmatprep.subr.bf16.mxu0 %v835_v8  ;;  %v306_v39 = vrot.slane %v301_v37, %v305_v36  ;;  %v310_v40 = vrot.slane %v302_v38, %v305_v36  ;;  %p963_p10 = scmp.ne.s32.totalorder %s1323_s19, %s962_s1  ;;  %s1056_s15 = smov [#allocation8]  }
  0x8a   : > { %s966_s6 = sshll.u32 %s1056_s15, 4  ;;  %s967_s6 = int_to_ptr.vmem [resolvable:$false] %s966_s6 }
  0x8b   : > { %p964_p0 = pnand %p963_p10, %p1404_p13  ;;  %s968_s25 = scalar_lea.vmem %s967_s6, 512 }
  0x8c   : > { %490 = vmatpush1.bf16.msra.mxu0 %v837_v9  ;;  %p969_p3 = scmp.lt.s32.totalorder %s1323_s19, %s967_s6  ;;  %p970_p1 = scmp.lt.s32.totalorder %s968_s25, %s962_s1 }
  0x8d   : > { %491 = vmatprep.subr.bf16.mxu0 %v838_v10  ;;  %p965_p7 = pneg %p964_p0 }
  0x8e   : > { %p971_p4 = por %p970_p1, %p969_p3 }
  0x90   : > { %492 = vmatpush1.bf16.msra.mxu0 %v840_v11  ;;  %p972_p2 = pnand %p971_p4, %p965_p7 }
  0x91   : > { %493 = vmatprep.subr.bf16.mxu0 %v841_v12 }
  0x94   : > { %494 = vmatpush1.bf16.msra.mxu0 %v843_v14 }
  0x95   : > { %495 = vmatprep.subr.bf16.mxu0 %v844_v15 }
  0x98   : > { %496 = vmatpush1.bf16.msra.mxu0 %v846_v16 }
  0x99   : > { %497 = vmatprep.subr.bf16.mxu0 %v847_v17 }
  0x9c   : > { %498 = vmatpush1.bf16.msra.mxu0 %v849_v18 }
  0x9d   : > { %499 = vmatprep.subr.bf16.mxu0 %v850_v19 }
  0xa0   : > { %500 = vmatpush1.bf16.msra.mxu0 %v852_v20 }
  0xa1   : > { %501 = vmatprep.subr.bf16.mxu0 %v853_v21 }
  0xa4   : > { %502 = vmatpush1.bf16.msra.mxu0 %v855_v22 }
  0xa5   : > { %503 = vmatprep.subr.bf16.mxu0 %v856_v23 }
  0xa8   : > { %504 = vmatpush1.bf16.msra.mxu0 %v858_v24 }
  0xa9   : > { %505 = vmatprep.subr.bf16.mxu0 %v859_v25 }
  0xac   : > { %506 = vmatpush1.bf16.msra.mxu0 %v861_v26 }
  0xad   : > { %507 = vmatprep.subr.bf16.mxu0 %v862_v27 }
  0xb0   : > { %508 = vmatpush1.bf16.msra.mxu0 %v864_v28 }
  0xb1   : > { %509 = vmatprep.subr.bf16.mxu0 %v865_v29 }
  0xb4   : > { %510 = vmatpush1.bf16.msra.mxu0 %v867_v30 }
  0xb5   : > { %511 = vmatprep.subr.bf16.mxu0 %v868_v31 }
  0xb8   : > { %512 = vmatpush1.bf16.msra.mxu0 %v870_v32 }
  0xbb   : > { %514 = vmatmul.mubr.bf16.vlgmr.msra.gmra.mrb[0].mxu0 %v871_v33 }
 0x18e   : > { %v515_v41 = vpop.f32.mrb[0].mxu0 }
 0x18f   : > { %v516_v42 = vadd.f32 %v515_v41, %v306_v39  ;;  %v517_v43 = vpop.f32.mrb[1].mxu0 }
 0x190   : > { %v518_v44 = vadd.f32 %v517_v43, %v310_v40  ;;  %v519_v45 = vpop.f32.mrb[2].mxu0 }
 0x191   : > { %v524_v46 = vmax.f32 %v516_v42, 0.0  ;;  %v520_v47 = vadd.f32 %v519_v45, %v306_v39  ;;  %v521_v48 = vpop.f32.mrb[3].mxu0 }
 0x192   : > { %v525_v49 = vmax.f32 %v518_v44, 0.0  ;;  %v522_v50 = vadd.f32 %v521_v48, %v310_v40 }
 0x193   : > { %v526_v51 = vmax.f32 %v520_v47, 0.0 }
 0x194   : > { %v736_v52 = vpack.c.bf16 %v525_v49, %v524_v46  ;;  %v527_v53 = vmax.f32 %v522_v50, 0.0 }
 0x196   : > { %540 = vst [vmem:[%s261_s10] sm:$0xff] %v736_v52  ;;  %v737_v54 = vpack.c.bf16 %v527_v53, %v526_v51 }
 0x198   : > { %541 = vst [vmem:[%s261_s10 + $0x8] sm:$0xff] %v737_v54 }
 0x199   : > { %975 = shalt.err (!%p972_p2)
}
 0x19a   : > { %s976_s26 = scalar_lea.hbm %s1328_s23, 256  ;;  %s980_s27 = scalar_lea.hbm %s1380_s3, 512 }
 0x19b   : > { %p977_p6 = scmp.ne.s32.totalorder %s1328_s23, %s976_s26  ;;  %p981_p5 = scmp.lt.u32.totalorder %s1328_s23, %s1380_s3 }
 0x19c   : > { %p982_p8 = scmp.lt.u32.totalorder %s980_s27, %s976_s26  ;;  %p984_p10 = scmp.lt.u32.totalorder %s976_s26, %s1328_s23 }
 0x19d   : > { %p978_p12 = pnand %p977_p6, %p1404_p13 }
 0x19e   : > { %p983_p11 = por %p982_p8, %p981_p5 }
 0x19f   : > { %p979_p9 = pneg %p978_p12 }
 0x1a0   : > { %p985_p0 = por %p984_p10, %p983_p11 }
 0x1a2   : > { %p986_p7 = pnand %p985_p0, %p979_p9 }
 0x1a4   : > { %989 = shalt.err (!%p986_p7)
}
 0x1a5   : > { %s1057_s8 = smov 128   ;;  %s1058_s10 = smov 256  }
 0x1a6   : > { %s1059_s11 = smov 8  }
 0x1a7   : > { %747 = dma.vmem_to_hbm [thread:$0]  (%p1404_p13), %s1323_s19, 256, %s1328_s23, %s543_s5, %s1057_s8, %s1058_s10, %s1059_s11  }
 0x1a8 PF: > { %s574_s22 = sand.u32 1, %s1028_s12   ;;  %p1405_p3 = scmp.ne.s32.totalorder %s1394_s4, 0 }
 0x1a9   : > { %p1406_p1 = scmp.ge.s32.totalorder %s1048_s17, 2  ;;  %s575_s9 = scalar_lea.sflag [#allocation4], %s574_s22 }
 0x1ab   : > { %p761_p4 = pnand %p1406_p1, %p1405_p3 }
 0x1ad   : > { %1023 = dma.done.wait (!%p761_p4), %s575_s9, 256  }
 0x1ae   : > { %1025 = vsyncadd (!%p761_p4), %s575_s9, 4294967040  ;;  %s20_s17 = sadd.s32 1, %s1048_s17   ;;  %s1407_s12 = smov %s1032_s13 }
 0x1af   : > { %p17_p2 = scmp.ge.s32.totalorder %s20_s17, 4   ;;  %s1408_s13 = smov %s1036_s14 }
 0x1b0   : > { %s1409_s14 = smov %s1131_s24  ;;  %s1410_s15 = smov %s1044_s16 }
 0x1b1   : > { %s1411_s16 = smov %s1413_s18  ;;  %19 = sbr.rel (!%p17_p2) target bundleno = 9 (0x9), region = 94 }
 0x1b8   :  { %580 = vsyncpa [#allocation3], 1 }
 0x1b9   :  { %582 = vsyncpa [#allocation3 + $0x1], 1 }
 0x1ba   :  { %583 = vsyncpa [#allocation6], 1 }
 0x1bb   :  { %585 = vsyncpa [#allocation6 + $0x1], 1 }
 0x1bc   :  { %586 = vsyncpa [#allocation4], 1 }
 0x1bd   :  { %588 = vsyncpa [#allocation4 + $0x1], 1 }

</bundles_post_ra>
